<compile_context>
chip_gen: v7x
topology: tpu7x:2x2x1
jax: 0.10.0
libtpu: 0.0.40
codegen_flags: <defaults>
</compile_context>

<pallas_src>
import jax
import jax.numpy as jnp
from jax.experimental import pallas as pl
from jax.experimental.pallas import tpu as pltpu


# ------------------------------- kernel -----------------------------------
def _double_conv_kernel(x_ref, t1_ref, t2_ref, bias_ref, out_ref):
    # x_ref:    (E, H, W*Cin)          lane-dense input rows (unpadded)
    # t1_ref:   (1, 3, W*Cin,  W*Cmid) block-Toeplitz RHS, conv1 (r/s/BN folded)
    # t2_ref:   (1, 3, W*Cmid, W*Cout) block-Toeplitz RHS, conv2 (r/s/BN folded)
    # bias_ref: (1, 2, Nmax)           row 0: tiled bias1, row 1: tiled bias2
    # out_ref:  (E, H, W*Cout)         lane-dense output
    E, H, _ = x_ref.shape
    N1 = t1_ref.shape[3]
    N2 = t2_ref.shape[3]

    def conv3x3(act, t_ref, n):
        # act: (E, H, K) lane-dense rows; width padding is inside t_ref,
        # height padding = two zero rows (sublane-only concat).
        K = act.shape[2]
        zrow = jnp.zeros((E, 1, K), jnp.float32)
        ap = jnp.concatenate([zrow, act, zrow], axis=1)        # (E, H+2, K)
        acc = jnp.zeros((E * H, n), jnp.float32)
        for kh in range(3):                                    # unrolled
            lhs = ap[:, kh:kh + H, :].reshape(E * H, K)
            acc = acc + jnp.dot(lhs, t_ref[0, kh],
                                preferred_element_type=jnp.float32)
        return acc                                             # (E*H, n)

    biases = bias_ref[...]                                     # (1, 2, Nmax)

    x = x_ref[...].astype(jnp.float32)                         # (E, H, W*Cin)
    h = conv3x3(x, t1_ref, N1)                                 # (E*H, W*Cmid)
    h = jnp.maximum(h + biases[0, 0:1, :N1], 0.0)              # bias+BN folded, ReLU
    h = h.reshape(E, H, N1)

    o = conv3x3(h, t2_ref, N2)                                 # (E*H, W*Cout)
    o = jnp.maximum(o + biases[0, 1:2, :N2], 0.0)

    out_ref[...] = o.reshape(E, H, N2).astype(out_ref.dtype)   # unmasked vst


# ------------------------------- wrapper -----------------------------------
def double_conv_pallas(x_nchw, params):
    """Run _DoubleConv. Input/output follow PyTorch NCHW convention."""
    B, Cin, H, W = x_nchw.shape
    t1, t2, bias = params["t1"], params["t2"], params["bias"]
    M = t1.shape[0]
    Cmid = t1.shape[-1] // W
    Cout = t2.shape[-1] // W
    nmax = bias.shape[-1]
    assert B % M == 0, "batch must be divisible by num_estimators"
    epe = B // M

    # NCHW -> NHWC -> lane-dense (B, H, W*Cin)  (W,C contiguous -> free merge).
    x = jnp.transpose(x_nchw, (0, 2, 3, 1)).reshape(B, H, W * Cin)

    grid_spec = pltpu.PrefetchScalarGridSpec(
        num_scalar_prefetch=0,
        grid=(M,),                       # one estimator group per step
        in_specs=[
            pl.BlockSpec((epe, H, W * Cin), lambda g: (g, 0, 0)),
            pl.BlockSpec((1, 3, W * Cin, W * Cmid), lambda g: (g, 0, 0, 0)),
            pl.BlockSpec((1, 3, W * Cmid, W * Cout), lambda g: (g, 0, 0, 0)),
            pl.BlockSpec((1, 2, nmax), lambda g: (g, 0, 0)),
        ],
        out_specs=pl.BlockSpec((epe, H, W * Cout), lambda g: (g, 0, 0)),
    )

    out = pl.pallas_call(
        _double_conv_kernel,
        out_shape=jax.ShapeDtypeStruct((B, H, W * Cout), jnp.float32),
        grid_spec=grid_spec,
        compiler_params=pltpu.CompilerParams(
            dimension_semantics=("parallel",),
            vmem_limit_bytes=32 * 1024 * 1024),
    )(x, t1, t2, bias)

    out = out.reshape(B, H, W, Cout)
    return jnp.transpose(out, (0, 3, 1, 2))   # back to NCHW


# ----------------------------- parameter setup -----------------------------
def _toeplitz_rhs(w_hwio, width):
    """(3,3,Ci,Co) folded conv weight -> (3, width*Ci, width*Co) block-Toeplitz.

    T[kh, w_in*Ci+ci, w_out*Co+co] = w[kh, w_in-w_out+1, ci, co] when the kw
    offset is in range, else 0 (implicit zero padding along width).
    """
    _, _, Ci, Co = w_hwio.shape
    w_in = jnp.arange(width)[:, None]
    w_out = jnp.arange(width)[None, :]
    kw = w_in - w_out + 1                                      # (W, W)
    valid = ((kw >= 0) & (kw <= 2)).astype(w_hwio.dtype)
    blocks = w_hwio[:, jnp.clip(kw, 0, 2)]                     # (3, W, W, Ci, Co)
    blocks = blocks * valid[None, :, :, None, None]
    blocks = blocks.transpose(0, 1, 3, 2, 4)                   # (3, W, Ci, W, Co)
    return blocks.reshape(3, width * Ci, width * Co)


def make_params(key, B, Cin, Cmid, Cout, W, num_estimators):
    ks = jax.random.split(key, 16)
    eps = 1e-5
    epe = B // num_estimators
    est = jnp.arange(B) // epe  # estimator index per example

    def pe(group):  # (M, C) -> per-example (B, 1, C) for the reference
        return group[est][:, None, :]

    # BatchConv2d #1 : shared conv weight + rank-1 r/s + per-estimator bias
    w1_oihw = 0.1 * jax.random.normal(ks[0], (Cmid, Cin, 3, 3), jnp.float32)
    r1 = 1.0 + 0.1 * jax.random.normal(ks[1], (num_estimators, Cin), jnp.float32)
    s1 = 1.0 + 0.1 * jax.random.normal(ks[2], (num_estimators, Cmid), jnp.float32)
    b1 = 0.1 * jax.random.normal(ks[3], (num_estimators, Cmid), jnp.float32)
    # BatchNorm2d #1 (eval mode)
    g1 = 1.0 + 0.1 * jax.random.normal(ks[4], (Cmid,), jnp.float32)
    be1 = 0.1 * jax.random.normal(ks[5], (Cmid,), jnp.float32)
    rm1 = 0.1 * jax.random.normal(ks[6], (Cmid,), jnp.float32)
    rv1 = 1.0 + 0.1 * jax.random.uniform(ks[7], (Cmid,), jnp.float32)
    sc1 = g1 / jnp.sqrt(rv1 + eps)
    sh1 = be1 - rm1 * sc1

    # BatchConv2d #2
    w2_oihw = 0.1 * jax.random.normal(ks[8], (Cout, Cmid, 3, 3), jnp.float32)
    r2 = 1.0 + 0.1 * jax.random.normal(ks[9], (num_estimators, Cmid), jnp.float32)
    s2 = 1.0 + 0.1 * jax.random.normal(ks[10], (num_estimators, Cout), jnp.float32)
    b2 = 0.1 * jax.random.normal(ks[11], (num_estimators, Cout), jnp.float32)
    # BatchNorm2d #2
    g2 = 1.0 + 0.1 * jax.random.normal(ks[12], (Cout,), jnp.float32)
    be2 = 0.1 * jax.random.normal(ks[13], (Cout,), jnp.float32)
    rm2 = 0.1 * jax.random.normal(ks[14], (Cout,), jnp.float32)
    rv2 = 1.0 + 0.1 * jax.random.uniform(ks[15], (Cout,), jnp.float32)
    sc2 = g2 / jnp.sqrt(rv2 + eps)
    sh2 = be2 - rm2 * sc2

    # ---- fold BatchEnsemble r/s and eval-mode BN into per-estimator conv ----
    #   relu( conv(x, Wf_e) + bf_e ) with
    #     Wf_e[kh,kw,ci,co] = W[kh,kw,ci,co] * r_e[ci] * s_e[co] * bn_scale[co]
    #     bf_e[co]          = b_e[co] * bn_scale[co] + bn_shift[co]
    w1_hwio = jnp.transpose(w1_oihw, (2, 3, 1, 0))             # (3,3,Cin,Cmid)
    w1_fold = (w1_hwio[None]
               * r1[:, None, None, :, None]
               * (s1 * sc1[None, :])[:, None, None, None, :])  # (M,3,3,Cin,Cmid)
    b1_fold = b1 * sc1[None, :] + sh1[None, :]                 # (M, Cmid)

    w2_hwio = jnp.transpose(w2_oihw, (2, 3, 1, 0))             # (3,3,Cmid,Cout)
    w2_fold = (w2_hwio[None]
               * r2[:, None, None, :, None]
               * (s2 * sc2[None, :])[:, None, None, None, :])  # (M,3,3,Cmid,Cout)
    b2_fold = b2 * sc2[None, :] + sh2[None, :]                 # (M, Cout)

    # ---- build per-estimator block-Toeplitz RHS (N = W*C lane-dense) ----
    t1 = jnp.stack([_toeplitz_rhs(w1_fold[e], W)
                    for e in range(num_estimators)])           # (M,3,W*Cin,W*Cmid)
    t2 = jnp.stack([_toeplitz_rhs(w2_fold[e], W)
                    for e in range(num_estimators)])           # (M,3,W*Cmid,W*Cout)

    nmax = max(W * Cmid, W * Cout)
    bias = jnp.zeros((num_estimators, 2, nmax), jnp.float32)
    bias = bias.at[:, 0, :W * Cmid].set(jnp.tile(b1_fold, (1, W)))
    bias = bias.at[:, 1, :W * Cout].set(jnp.tile(b2_fold, (1, W)))

    return dict(
        # kernel-facing (folded, Toeplitz) parameters
        t1=t1, t2=t2, bias=bias,
        # reference-only (unfolded) parameters
        _w1_oihw=w1_oihw, _w2_oihw=w2_oihw,
        r1_pe=pe(r1), s1_pe=pe(s1), b1_pe=pe(b1),
        r2_pe=pe(r2), s2_pe=pe(s2), b2_pe=pe(b2),
        bn1_scale=sc1[None, :], bn1_shift=sh1[None, :],
        bn2_scale=sc2[None, :], bn2_shift=sh2[None, :],
    )


def ref_forward(x_nchw, p):
    """Pure-JAX reference (NCHW) mirroring the PyTorch module (eval mode)."""
    def bconv(x, w_oihw, r_pe, s_pe, b_pe):
        xr = x * jnp.transpose(r_pe, (0, 2, 1))[:, :, :, None]   # (B,C,1,1)
        y = jax.lax.conv_general_dilated(
            xr, w_oihw, (1, 1), ((1, 1), (1, 1)),
            dimension_numbers=("NCHW", "OIHW", "NCHW"))
        return (y * jnp.transpose(s_pe, (0, 2, 1))[:, :, :, None]
                + jnp.transpose(b_pe, (0, 2, 1))[:, :, :, None])

    def bn_relu(y, scale, shift):
        return jnp.maximum(y * scale[0][None, :, None, None]
                           + shift[0][None, :, None, None], 0.0)

    h = bn_relu(bconv(x_nchw, p["_w1_oihw"], p["r1_pe"], p["s1_pe"], p["b1_pe"]),
                p["bn1_scale"], p["bn1_shift"])
    o = bn_relu(bconv(h, p["_w2_oihw"], p["r2_pe"], p["s2_pe"], p["b2_pe"]),
                p["bn2_scale"], p["bn2_shift"])
    return o


if __name__ == "__main__":
    # _DoubleConv(in_channels=4, out_channels=8, num_estimators=2)
    B, Cin, Cmid, Cout, H, W, M = 4, 4, 8, 8, 16, 16, 2   # B divisible by M

    key = jax.random.PRNGKey(0)
    kx, kp = jax.random.split(key)
    x = jax.random.normal(kx, (B, Cin, H, W), jnp.float32)   # NCHW like PyTorch
    params = make_params(kp, B, Cin, Cmid, Cout, W, M)

    out = jax.block_until_ready(double_conv_pallas(x, params))
    ref = jax.block_until_ready(ref_forward(x, params))

    assert out.shape == (B, Cout, H, W), out.shape
    assert jnp.allclose(out, ref, rtol=1e-3, atol=1e-3), \
        float(jnp.max(jnp.abs(out - ref)))

    print("KERNEL_OK")
</pallas_src>

<mosaic_0001>
module attributes {stable_mosaic.version = 11 : i64} {
  func.func @_double_conv_kernel(%arg0: i32, %arg1: memref<2x16x64xf32, #tpu.memory_space<vmem>>, %arg2: memref<1x3x64x128xf32, #tpu.memory_space<vmem>>, %arg3: memref<1x3x128x128xf32, #tpu.memory_space<vmem>>, %arg4: memref<1x2x128xf32, #tpu.memory_space<vmem>>, %arg5: memref<2x16x128xf32, #tpu.memory_space<vmem>>) attributes {dimension_semantics = [#tpu.dimension_semantics<parallel>], iteration_bounds = array<i64: 2>, scalar_prefetch = 0 : i64, scratch_operands = 0 : i64, tpu.core_type = #tpu.core_type<tc>, window_params = [{transform_indices = @transform_0, window_bounds = array<i64: 2, 16, 64>}, {transform_indices = @transform_1, window_bounds = array<i64: 1, 3, 64, 128>}, {transform_indices = @transform_2, window_bounds = array<i64: 1, 3, 128, 128>}, {transform_indices = @transform_3, window_bounds = array<i64: 1, 2, 128>}, {transform_indices = @transform_4, window_bounds = array<i64: 2, 16, 128>}]} {
    %c0 = arith.constant 0 : index
    %c0_0 = arith.constant 0 : index
    %c0_1 = arith.constant 0 : index
    %0 = vector.load %arg4[%c0, %c0_0, %c0_1] : memref<1x2x128xf32, #tpu.memory_space<vmem>>, vector<1x2x128xf32>
    %c0_2 = arith.constant 0 : index
    %c0_3 = arith.constant 0 : index
    %c0_4 = arith.constant 0 : index
    %1 = vector.load %arg1[%c0_2, %c0_3, %c0_4] : memref<2x16x64xf32, #tpu.memory_space<vmem>>, vector<2x16x64xf32>
    %cst = arith.constant 0.000000e+00 : f32
    %2 = vector.broadcast %cst : f32 to vector<2x1x64xf32>
    %3 = tpu.concatenate %2, %1, %2 in 1 : vector<2x1x64xf32>, vector<2x16x64xf32>, vector<2x1x64xf32> -> vector<2x18x64xf32>
    %cst_5 = arith.constant 0.000000e+00 : f32
    %4 = vector.broadcast %cst_5 : f32 to vector<32x128xf32>
    %5 = vector.extract_strided_slice %3 {offsets = [0, 0, 0], sizes = [2, 16, 64], strides = [1, 1, 1]} : vector<2x18x64xf32> to vector<2x16x64xf32>
    %6 = vector.shape_cast %5 : vector<2x16x64xf32> to vector<32x64xf32>
    %c0_6 = arith.constant 0 : index
    %c0_7 = arith.constant 0 : index
    %c0_8 = arith.constant 0 : index
    %c0_9 = arith.constant 0 : index
    %7 = vector.load %arg2[%c0_6, %c0_7, %c0_8, %c0_9] : memref<1x3x64x128xf32, #tpu.memory_space<vmem>>, vector<1x1x64x128xf32>
    %8 = vector.shape_cast %7 : vector<1x1x64x128xf32> to vector<64x128xf32>
    %cst_10 = arith.constant dense<0.000000e+00> : vector<32x128xf32>
    %9 = tpu.matmul %6, %8, %cst_10 {dimension_numbers = #tpu.dot_dimension_numbers<[1], [0], [0], [1], [0, 0, 1, 1], [], []>} : vector<32x64xf32>, vector<64x128xf32>, vector<32x128xf32> -> vector<32x128xf32>
    %10 = arith.addf %4, %9 : vector<32x128xf32>
    %11 = vector.extract_strided_slice %3 {offsets = [0, 1, 0], sizes = [2, 16, 64], strides = [1, 1, 1]} : vector<2x18x64xf32> to vector<2x16x64xf32>
    %12 = vector.shape_cast %11 : vector<2x16x64xf32> to vector<32x64xf32>
    %c0_11 = arith.constant 0 : index
    %c1 = arith.constant 1 : index
    %c0_12 = arith.constant 0 : index
    %c0_13 = arith.constant 0 : index
    %13 = vector.load %arg2[%c0_11, %c1, %c0_12, %c0_13] : memref<1x3x64x128xf32, #tpu.memory_space<vmem>>, vector<1x1x64x128xf32>
    %14 = vector.shape_cast %13 : vector<1x1x64x128xf32> to vector<64x128xf32>
    %cst_14 = arith.constant dense<0.000000e+00> : vector<32x128xf32>
    %15 = tpu.matmul %12, %14, %cst_14 {dimension_numbers = #tpu.dot_dimension_numbers<[1], [0], [0], [1], [0, 0, 1, 1], [], []>} : vector<32x64xf32>, vector<64x128xf32>, vector<32x128xf32> -> vector<32x128xf32>
    %16 = arith.addf %10, %15 : vector<32x128xf32>
    %17 = vector.extract_strided_slice %3 {offsets = [0, 2, 0], sizes = [2, 16, 64], strides = [1, 1, 1]} : vector<2x18x64xf32> to vector<2x16x64xf32>
    %18 = vector.shape_cast %17 : vector<2x16x64xf32> to vector<32x64xf32>
    %c0_15 = arith.constant 0 : index
    %c2 = arith.constant 2 : index
    %c0_16 = arith.constant 0 : index
    %c0_17 = arith.constant 0 : index
    %19 = vector.load %arg2[%c0_15, %c2, %c0_16, %c0_17] : memref<1x3x64x128xf32, #tpu.memory_space<vmem>>, vector<1x1x64x128xf32>
    %20 = vector.shape_cast %19 : vector<1x1x64x128xf32> to vector<64x128xf32>
    %cst_18 = arith.constant dense<0.000000e+00> : vector<32x128xf32>
    %21 = tpu.matmul %18, %20, %cst_18 {dimension_numbers = #tpu.dot_dimension_numbers<[1], [0], [0], [1], [0, 0, 1, 1], [], []>} : vector<32x64xf32>, vector<64x128xf32>, vector<32x128xf32> -> vector<32x128xf32>
    %22 = arith.addf %16, %21 : vector<32x128xf32>
    %23 = vector.extract_strided_slice %0 {offsets = [0, 0, 0], sizes = [1, 1, 128], strides = [1, 1, 1]} : vector<1x2x128xf32> to vector<1x1x128xf32>
    %24 = vector.shape_cast %23 : vector<1x1x128xf32> to vector<1x128xf32>
    %25 = vector.broadcast %24 : vector<1x128xf32> to vector<32x128xf32>
    %26 = arith.addf %22, %25 : vector<32x128xf32>
    %cst_19 = arith.constant 0.000000e+00 : f32
    %27 = vector.broadcast %cst_19 : f32 to vector<32x128xf32>
    %28 = arith.maximumf %26, %27 : vector<32x128xf32>
    %29 = vector.shape_cast %28 : vector<32x128xf32> to vector<2x16x128xf32>
    %cst_20 = arith.constant 0.000000e+00 : f32
    %30 = vector.broadcast %cst_20 : f32 to vector<2x1x128xf32>
    %31 = tpu.concatenate %30, %29, %30 in 1 : vector<2x1x128xf32>, vector<2x16x128xf32>, vector<2x1x128xf32> -> vector<2x18x128xf32>
    %cst_21 = arith.constant 0.000000e+00 : f32
    %32 = vector.broadcast %cst_21 : f32 to vector<32x128xf32>
    %33 = vector.extract_strided_slice %31 {offsets = [0, 0, 0], sizes = [2, 16, 128], strides = [1, 1, 1]} : vector<2x18x128xf32> to vector<2x16x128xf32>
    %34 = vector.shape_cast %33 : vector<2x16x128xf32> to vector<32x128xf32>
    %c0_22 = arith.constant 0 : index
    %c0_23 = arith.constant 0 : index
    %c0_24 = arith.constant 0 : index
    %c0_25 = arith.constant 0 : index
    %35 = vector.load %arg3[%c0_22, %c0_23, %c0_24, %c0_25] : memref<1x3x128x128xf32, #tpu.memory_space<vmem>>, vector<1x1x128x128xf32>
    %36 = vector.shape_cast %35 : vector<1x1x128x128xf32> to vector<128x128xf32>
    %cst_26 = arith.constant dense<0.000000e+00> : vector<32x128xf32>
    %37 = tpu.matmul %34, %36, %cst_26 {dimension_numbers = #tpu.dot_dimension_numbers<[1], [0], [0], [1], [0, 0, 1, 1], [], []>} : vector<32x128xf32>, vector<128x128xf32>, vector<32x128xf32> -> vector<32x128xf32>
    %38 = arith.addf %32, %37 : vector<32x128xf32>
    %39 = vector.extract_strided_slice %31 {offsets = [0, 1, 0], sizes = [2, 16, 128], strides = [1, 1, 1]} : vector<2x18x128xf32> to vector<2x16x128xf32>
    %40 = vector.shape_cast %39 : vector<2x16x128xf32> to vector<32x128xf32>
    %c0_27 = arith.constant 0 : index
    %c1_28 = arith.constant 1 : index
    %c0_29 = arith.constant 0 : index
    %c0_30 = arith.constant 0 : index
    %41 = vector.load %arg3[%c0_27, %c1_28, %c0_29, %c0_30] : memref<1x3x128x128xf32, #tpu.memory_space<vmem>>, vector<1x1x128x128xf32>
    %42 = vector.shape_cast %41 : vector<1x1x128x128xf32> to vector<128x128xf32>
    %cst_31 = arith.constant dense<0.000000e+00> : vector<32x128xf32>
    %43 = tpu.matmul %40, %42, %cst_31 {dimension_numbers = #tpu.dot_dimension_numbers<[1], [0], [0], [1], [0, 0, 1, 1], [], []>} : vector<32x128xf32>, vector<128x128xf32>, vector<32x128xf32> -> vector<32x128xf32>
    %44 = arith.addf %38, %43 : vector<32x128xf32>
    %45 = vector.extract_strided_slice %31 {offsets = [0, 2, 0], sizes = [2, 16, 128], strides = [1, 1, 1]} : vector<2x18x128xf32> to vector<2x16x128xf32>
    %46 = vector.shape_cast %45 : vector<2x16x128xf32> to vector<32x128xf32>
    %c0_32 = arith.constant 0 : index
    %c2_33 = arith.constant 2 : index
    %c0_34 = arith.constant 0 : index
    %c0_35 = arith.constant 0 : index
    %47 = vector.load %arg3[%c0_32, %c2_33, %c0_34, %c0_35] : memref<1x3x128x128xf32, #tpu.memory_space<vmem>>, vector<1x1x128x128xf32>
    %48 = vector.shape_cast %47 : vector<1x1x128x128xf32> to vector<128x128xf32>
    %cst_36 = arith.constant dense<0.000000e+00> : vector<32x128xf32>
    %49 = tpu.matmul %46, %48, %cst_36 {dimension_numbers = #tpu.dot_dimension_numbers<[1], [0], [0], [1], [0, 0, 1, 1], [], []>} : vector<32x128xf32>, vector<128x128xf32>, vector<32x128xf32> -> vector<32x128xf32>
    %50 = arith.addf %44, %49 : vector<32x128xf32>
    %51 = vector.extract_strided_slice %0 {offsets = [0, 1, 0], sizes = [1, 1, 128], strides = [1, 1, 1]} : vector<1x2x128xf32> to vector<1x1x128xf32>
    %52 = vector.shape_cast %51 : vector<1x1x128xf32> to vector<1x128xf32>
    %53 = vector.broadcast %52 : vector<1x128xf32> to vector<32x128xf32>
    %54 = arith.addf %50, %53 : vector<32x128xf32>
    %cst_37 = arith.constant 0.000000e+00 : f32
    %55 = vector.broadcast %cst_37 : f32 to vector<32x128xf32>
    %56 = arith.maximumf %54, %55 : vector<32x128xf32>
    %57 = vector.shape_cast %56 : vector<32x128xf32> to vector<2x16x128xf32>
    %c0_38 = arith.constant 0 : index
    %c0_39 = arith.constant 0 : index
    %c0_40 = arith.constant 0 : index
    %58 = vector.load %arg5[%c0_38, %c0_39, %c0_40] : memref<2x16x128xf32, #tpu.memory_space<vmem>>, vector<2x16x128xf32>
    tpu.vector_store %arg5[%c0_38, %c0_39, %c0_40], %57 {strides = array<i32>} : memref<2x16x128xf32, #tpu.memory_space<vmem>>, vector<2x16x128xf32>,
    return
  }
  func.func @transform_0(%arg0: i32) -> (i32, i32, i32) {
    %c0_i32 = arith.constant 0 : i32
    %c0_i32_0 = arith.constant 0 : i32
    %c0_i32_1 = arith.constant 0 : i32
    return %arg0, %c0_i32, %c0_i32_0 : i32, i32, i32
  }
  func.func @transform_1(%arg0: i32) -> (i32, i32, i32, i32) {
    %c0_i32 = arith.constant 0 : i32
    %c0_i32_0 = arith.constant 0 : i32
    %c0_i32_1 = arith.constant 0 : i32
    %c0_i32_2 = arith.constant 0 : i32
    return %arg0, %c0_i32, %c0_i32_0, %c0_i32_1 : i32, i32, i32, i32
  }
  func.func @transform_2(%arg0: i32) -> (i32, i32, i32, i32) {
    %c0_i32 = arith.constant 0 : i32
    %c0_i32_0 = arith.constant 0 : i32
    %c0_i32_1 = arith.constant 0 : i32
    %c0_i32_2 = arith.constant 0 : i32
    return %arg0, %c0_i32, %c0_i32_0, %c0_i32_1 : i32, i32, i32, i32
  }
  func.func @transform_3(%arg0: i32) -> (i32, i32, i32) {
    %c0_i32 = arith.constant 0 : i32
    %c0_i32_0 = arith.constant 0 : i32
    %c0_i32_1 = arith.constant 0 : i32
    return %arg0, %c0_i32, %c0_i32_0 : i32, i32, i32
  }
  func.func @transform_4(%arg0: i32) -> (i32, i32, i32) {
    %c0_i32 = arith.constant 0 : i32
    %c0_i32_0 = arith.constant 0 : i32
    %c0_i32_1 = arith.constant 0 : i32
    return %arg0, %c0_i32, %c0_i32_0 : i32, i32, i32
  }
}

</mosaic_0001>

<bundles_post_ra>
// kernel: tpu_custom_call.1
= control target key start
LH: loop header
LB: loop body
LE: loop exit
PB: predicated region body
PF: predicated region fallthrough
CT: control target
= control target key end

     0   :  { %s2409_s0 = inlined_call_operand.hbm [shape: f32[4,16,64], index: 0, kind: input, shape index: {}]   ;;  %s2410_s1 = inlined_call_operand.hbm [shape: f32[2,3,64,128], index: 1, kind: input, shape index: {}]   ;;  %s2411_s2 = inlined_call_operand.hbm [shape: f32[2,3,128,128], index: 2, kind: input, shape index: {}]   ;;  %s2412_s3 = inlined_call_operand.vmem [shape: f32[2,2,128], index: 3, kind: input, shape index: {}]   ;;  %s2413_s4 = inlined_call_operand.hbm [shape: f32[4,16,128], index: 4, kind: output, shape index: {}]  }
   0x1   :  { %2417 = sst [smem:[#allocation14_spill]] %s2410_s1 }
   0x2   :  { %9 = vsyncpa [#allocation3], 0 }
   0x3   :  { %11 = vsyncpa [#allocation3 + $0x1], 0 }
   0x4   :  { %12 = vsyncpa [#allocation6], 0 }
   0x5   :  { %14 = vsyncpa [#allocation6 + $0x1], 0 }
   0x6   :  { %15 = vsyncpa [#allocation4], 0 }
   0x7   :  { %17 = vsyncpa [#allocation4 + $0x1], 0  ;;  %s1989_s15 = smov 0   ;;  %s1991_s16 = smov 0  }
   0x8   :  { %s1993_s17 = smov 0   ;;  %s1995_s18 = smov 0  }
   0x9 LB: > { %2418 = sst [smem:[#allocation12_spill]] %s1950_s17  ;;  %s2010_s19 = sadd.s32 4294967295, %s1954_s18   ;;  %s1954_s18 = sphi %s1995_s18, %s2439_s18   ;;  %s1950_s17 = sphi %s1993_s17, %s2438_s17   ;;  %s1946_s16 = sphi %s1991_s16, %s2437_s16   ;;  %s1942_s15 = sphi %s1989_s15, %s2436_s15  }
   0xa   : > { %s1205_s20 = sadd.s32 4294967294, %s1954_s18   ;;  %s2014_s21 = sadd.s32 1, %s1954_s18  }
   0xb   : > { %s30_s22 = sadd.s32 1, %s1950_s17  ;;  %s27_s23 = ssub.s32 %s1954_s18, %s2014_s21 }
   0xc   : > { %p37_p0 = scmp.ne.s32.totalorder %s1950_s17, %s1946_s16  ;;  %p28_p1 = scmp.eq.s32.totalorder %s27_s23, 0 }
   0xd   : > { %p38_p2 = scmp.eq.s32.totalorder %s1954_s18, 0  ;;  %p43_p3 = scmp.ne.s32.totalorder %s1946_s16, %s1942_s15 }
   0xe   : > { %p44_p4 = scmp.eq.s32.totalorder %s2010_s19, 0  ;;  %p145_p7 = scmp.eq.s32.totalorder %s2010_s19, 1 }
   0xf   : > { %s2026_s24 = scalar_select %p28_p1, %s1950_s17, %s30_s22  }
  0x10   : > { %p39_p5 = por %p38_p2, %p37_p0  ;;  %p2028_p6 = por %p44_p4, %p43_p3 }
  0x11   : > { %2419 = sst [smem:[#allocation13_spill]] %s2026_s24  ;;  %p151_p8 = scmp.eq.s32.totalorder %s1205_s20, 1 }
  0x12   : > { %s2420_s25 = scalar_select %p2028_p6, 1, 0 }
  0x13   : > { %p1756_p10 = scmp.lt.s32.totalorder %s1954_s18, 2  ;;  %p2035_p11 = por %p145_p7, %p37_p0 }
  0x14   : > { %p2039_p12 = por %p151_p8, %p43_p3  ;;  %s2044_s28 = sand.u32 1, %s1950_s17  }
  0x15   : > { %s2421_s26 = scalar_select %p2035_p11, 1, 0 }
  0x16   : > { %s2422_s27 = scalar_select %p2039_p12, 1, 0 }
  0x17   : > { %p2046_p13 = pnand %p1756_p10, %p39_p5  ;;  %s193_s30 = sand.u32 1, %s1954_s18  }
  0x18   : > { %s1728_s5 = smul.u32 192, %s2044_s28  ;;  %p1214_p1 = scmp.ge.s32.totalorder %s1954_s18, 1 }
  0x19   : > { %s1729_s6 = smul.u32 3072, %s1954_s18  ;;  %p240_p0 = scmp.lt.s32.totalorder %s1954_s18, 3 }
  0x1a   : > { %s2424_s1 = sld [smem:[#allocation14_spill]]  ;;  %s197_s10 = scalar_lea.vmem [#allocation5], %s1728_s5 }
  0x1b   : > { %s204_s11 = sshll.u32 %s197_s10, 4  ;;  %p2062_p2 = pnand %p1214_p1, %p240_p0  ;;  %s2060_s11 = int_to_ptr.vmem [resolvable:$true] %s204_s11 }
  0x1c   : > { %s2066_s13 = scalar_lea.sflag [#allocation6], %s193_s30  ;;  %p2072_p4 = pneg %p2046_p13 }
  0x1d   : > { %s2425_s12 = scalar_select %p2062_p2, 1, 0 }
  0x20   : > { %s2058_s9 = scalar_lea.hbm %s2424_s1, %s1729_s6  ;;  %s1799_s5 = scalar_lea.hbm %s2424_s1, 6144 }
  0x21   : > { %s1794_s14 = scalar_lea.hbm %s2058_s9, 3072  ;;  %p1800_p8 = scmp.lt.u32.totalorder %s2058_s9, %s2424_s1 }
  0x22   : > { %p1795_p3 = scmp.ne.s32.totalorder %s2058_s9, %s1794_s14  ;;  %p1801_p10 = scmp.lt.u32.totalorder %s1799_s5, %s1794_s14 }
  0x23   : > { %p1803_p0 = scmp.lt.u32.totalorder %s1794_s14, %s2058_s9 }
  0x24   : > { %p1797_p5 = pnand %p2072_p4, %p1795_p3  ;;  %p1802_p1 = por %p1801_p10, %p1800_p8 }
  0x26   : > { %p1798_p7 = pneg %p1797_p5  ;;  %p1804_p9 = por %p1803_p0, %p1802_p1 }
  0x28   : > { %p1805_p12 = pnand %p1804_p9, %p1798_p7 }
  0x2a   : > { %1808 = shalt.err (!%p1805_p12)
}
  0x2b   : > { %s1809_s30 = scalar_lea.vmem %s2060_s11, 3072  ;;  %s1956_s8 = smov [#allocation5]  }
  0x2c   : > { %p1810_p3 = scmp.ne.s32.totalorder %s2060_s11, %s1809_s30  ;;  %s1814_s10 = sshll.u32 %s1956_s8, 4  ;;  %s1815_s10 = int_to_ptr.vmem [resolvable:$false] %s1814_s10 }
  0x2d   : > { %s1816_s22 = scalar_lea.vmem %s1815_s10, 6144  ;;  %p1817_p6 = scmp.lt.s32.totalorder %s2060_s11, %s1815_s10 }
  0x2e   : > { %p1812_p5 = pnand %p1810_p3, %p2072_p4  ;;  %p1818_p2 = scmp.lt.s32.totalorder %s1816_s22, %s1809_s30 }
  0x30   : > { %p1813_p11 = pneg %p1812_p5  ;;  %p1819_p8 = por %p1818_p2, %p1817_p6 }
  0x32   : > { %p1820_p10 = pnand %p1819_p8, %p1813_p11 }
  0x34   : > { %1823 = shalt.err (!%p1820_p10)
}
  0x35   : > { %s1957_s14 = smov 128   ;;  %s1958_s23 = smov 8  }
  0x36   : > { %1748 = dma.hbm_to_vmem [thread:$0]  (!%p2046_p13), %s2058_s9, 3072, %s2060_s11, %s2066_s13, %s1957_s14, %s1957_s14, %s1958_s23  }
  0x37   : > { %s1208_s5 = sshll.u32 %s2044_s28, 5  ;;  %s1289_s6 = sshll.u32 %s1954_s18, 9 }
  0x38   : > { %s2104_s8 = scalar_lea.hbm %s2409_s0, %s1289_s6  ;;  %s175_s10 = scalar_lea.vmem [#allocation2], %s1208_s5 }
  0x39   : > { %s183_s22 = sshll.u32 %s175_s10, 4  ;;  %s1730_s1 = smul.u32 384, %s2044_s28  ;;  %s2106_s22 = int_to_ptr.vmem [resolvable:$true] %s183_s22 }
  0x3a   : > { %s172_s24 = scalar_lea.sflag [#allocation3], %s2044_s28  ;;  %s1824_s17 = scalar_lea.hbm %s2104_s8, 512 }
  0x3b   : > { %p1825_p6 = scmp.ne.s32.totalorder %s2104_s8, %s1824_s17  ;;  %s1829_s6 = scalar_lea.hbm %s2409_s0, 1024 }
  0x3c   : > { %p1830_p12 = scmp.lt.u32.totalorder %s2104_s8, %s2409_s0  ;;  %p1831_p2 = scmp.lt.u32.totalorder %s1829_s6, %s1824_s17 }
  0x3d   : > { %p1827_p9 = pnand %p1825_p6, %p2072_p4  ;;  %p1833_p1 = scmp.lt.u32.totalorder %s1824_s17, %s2104_s8 }
  0x3e   : > { %p1832_p7 = por %p1831_p2, %p1830_p12 }
  0x3f   : > { %p1828_p11 = pneg %p1827_p9 }
  0x40   : > { %p1834_p0 = por %p1833_p1, %p1832_p7 }
  0x42   : > { %p1835_p3 = pnand %p1834_p0, %p1828_p11 }
  0x44   : > { %1838 = shalt.err (!%p1835_p3)
}
  0x45   : > { %s1839_s5 = scalar_lea.vmem %s2106_s22, 512  ;;  %s1959_s10 = smov [#allocation2]  }
  0x46   : > { %p1840_p5 = scmp.ne.s32.totalorder %s2106_s22, %s1839_s5  ;;  %s1844_s9 = sshll.u32 %s1959_s10, 4  ;;  %s1845_s9 = int_to_ptr.vmem [resolvable:$false] %s1844_s9 }
  0x47   : > { %s1846_s11 = scalar_lea.vmem %s1845_s9, 1024  ;;  %p1847_p6 = scmp.lt.s32.totalorder %s2106_s22, %s1845_s9 }
  0x48   : > { %p1842_p8 = pnand %p1840_p5, %p2072_p4  ;;  %p1848_p9 = scmp.lt.s32.totalorder %s1846_s11, %s1839_s5 }
  0x4a   : > { %p1843_p10 = pneg %p1842_p8  ;;  %p1849_p12 = por %p1848_p9, %p1847_p6 }
  0x4c   : > { %p1850_p2 = pnand %p1849_p12, %p1843_p10 }
  0x4e   : > { %1853 = shalt.err (!%p1850_p2)
}
  0x4f   : > { %1745 = dma.hbm_to_vmem [thread:$0]  (!%p2046_p13), %s2104_s8, 512, %s2106_s22, %s172_s24, %s1957_s14, %s1957_s14, %s1958_s23  }
  0x50   : > { %s1731_s17 = smul.u32 6144, %s1954_s18  ;;  %s218_s6 = scalar_lea.vmem [#allocation7], %s1730_s1 }
  0x51   : > { %s225_s7 = sshll.u32 %s218_s6, 4  ;;  %s1859_s1 = scalar_lea.hbm %s2411_s2, 12288  ;;  %s2144_s7 = int_to_ptr.vmem [resolvable:$true] %s225_s7 }
  0x52   : > { %s2142_s10 = scalar_lea.hbm %s2411_s2, %s1731_s17 }
  0x53   : > { %s1854_s9 = scalar_lea.hbm %s2142_s10, 6144  ;;  %p1860_p0 = scmp.lt.u32.totalorder %s2142_s10, %s2411_s2 }
  0x54   : > { %p1855_p11 = scmp.ne.s32.totalorder %s2142_s10, %s1854_s9  ;;  %p1861_p3 = scmp.lt.u32.totalorder %s1859_s1, %s1854_s9 }
  0x55   : > { %p1863_p8 = scmp.lt.u32.totalorder %s1854_s9, %s2142_s10 }
  0x56   : > { %p1857_p7 = pnand %p1855_p11, %p2072_p4  ;;  %p1862_p5 = por %p1861_p3, %p1860_p0 }
  0x58   : > { %p1858_p1 = pneg %p1857_p7  ;;  %p1864_p10 = por %p1863_p8, %p1862_p5 }
  0x5a   : > { %p1865_p6 = pnand %p1864_p10, %p1858_p1 }
  0x5c   : > { %1868 = shalt.err (!%p1865_p6)
}
  0x5d   : > { %s1869_s11 = scalar_lea.vmem %s2144_s7, 6144  ;;  %s1960_s17 = smov [#allocation7]  }
  0x5e   : > { %p1870_p9 = scmp.ne.s32.totalorder %s2144_s7, %s1869_s11  ;;  %s1874_s6 = sshll.u32 %s1960_s17, 4  ;;  %s1875_s6 = int_to_ptr.vmem [resolvable:$false] %s1874_s6 }
  0x5f   : > { %s1876_s30 = scalar_lea.vmem %s1875_s6, 12288  ;;  %p1877_p11 = scmp.lt.s32.totalorder %s2144_s7, %s1875_s6 }
  0x60   : > { %p1872_p12 = pnand %p1870_p9, %p2072_p4  ;;  %p1878_p7 = scmp.lt.s32.totalorder %s1876_s30, %s1869_s11 }
  0x62   : > { %p1873_p2 = pneg %p1872_p12  ;;  %p1879_p0 = por %p1878_p7, %p1877_p11 }
  0x64   : > { %p1880_p3 = pnand %p1879_p0, %p1873_p2 }
  0x66   : > { %1883 = shalt.err (!%p1880_p3)
}
  0x67   : > { %1751 = dma.hbm_to_vmem [thread:$0]  (!%p2046_p13), %s2142_s10, 6144, %s2144_s7, %s2066_s13, %s1957_s14, %s1957_s14, %s1958_s23  }
  0x68   : > { %p2427_p4 = scmp.ne.s32.totalorder %s2425_s12, 0 }
  0x69   : > { %s2174_s20 = sand.u32 (!%p2427_p4), 1, %s1946_s16   ;;  %p2428_p1 = scmp.ne.s32.totalorder (!%p2427_p4), %s2420_s25, 0 }
  0x6a   : > { %244 = sbr.rel (%p2427_p4) target bundleno = 660 (0x294), region = 36  ;;  %s1215_s5 = sshll.u32 (!%p2427_p4), %s2174_s20, 5 }
  0x6b   : > { %s247_s9 = scalar_lea.sflag (!%p2427_p4), [#allocation3], %s2174_s20  ;;  %s250_s29 = scalar_lea.vmem (!%p2427_p4), [#allocation2], %s1215_s5 }
  0x71   : > { %1929 = dma.done.wait (%p2428_p1), %s247_s9, 512  }
  0x72   : > { %1931 = vsyncadd (%p2428_p1), %s247_s9, 4294966784  ;;  %s255_s12 = sand.u32 1, %s2010_s19   ;;  %s1732_s13 = smul.u32 192, %s2174_s20 }
  0x73   : > { %s256_s14 = scalar_lea.sflag [#allocation6], %s255_s12 }
  0x74   : > { %s2186_s23 = scalar_lea.vmem [#allocation5], %s1732_s13 }
  0x75   : > { %1933 = dma.done.wait (%p2428_p1), %s256_s14, 9216  }
  0x76   : > { %1935 = vsyncadd (%p2428_p1), %s256_s14, 4294958080  ;;  %v1218_v0 = vld [vmem:[%s2186_s23 + $0x40] sm:$0xff]  ;;  %v1219_v1 = vld [vmem:[%s2186_s23 + $0x48] sm:$0xff]  ;;  %vm322_vm0 = vcmask 1040384   ;;  %s1733_s25 = smul.u32 384, %s2174_s20  ;;  %vm349_vm1 = vcmask 1046528  }
  0x77   : > { %v1220_v2 = vld [vmem:[%s2186_s23 + $0x50] sm:$0xff]  ;;  %v1568_v3 = vpack.c.bf16 %v1219_v1, %v1218_v0  ;;  %v1221_v4 = vld [vmem:[%s2186_s23 + $0x58] sm:$0xff]  ;;  %v1222_v6 = vld [vmem:[%s2186_s23 + $0x60] sm:$0xff]  ;;  %vm369_vm2 = vcmask 523264   ;;  %vm556_vm3 = vcmask 1045504   ;;  %p308_p13 = scmp.lt.s32.totalorder %s2010_s19, 1 }
  0x78   : > { %v1572_v5 = vpack.c.bf16 %v1221_v4, %v1220_v2  ;;  %v1223_v7 = vld [vmem:[%s2186_s23 + $0x68] sm:$0xff]  ;;  %v314_v8 = vld [vmem:[%s250_s29] sm:$0xff]  ;;  %v316_v14 = vld [vmem:[%s250_s29 + $0x10] sm:$0xff]  ;;  %s2213_s7 = scalar_lea.vmem [#allocation7], %s1733_s25  ;;  %s306_s22 = scalar_lea.vmem [#allocation8], %s1215_s5 }
  0x79   : > { %1569 = vmatprep.subr.bf16.mxu0 %v1568_v3  ;;  %v315_v9 = vld [vmem:[%s250_s29 + $0x8] sm:$0xff]  ;;  %v323_v10 = vrot.slane %v314_v8, 7  ;;  %v1576_v12 = vpack.c.bf16 %v1223_v7, %v1222_v6  ;;  %v317_v15 = vld [vmem:[%s250_s29 + $0x18] sm:$0xff]  ;;  %v1224_v16 = vld [vmem:[%s2186_s23 + $0x70] sm:$0xff]  ;;  %v326_v21 = vrot.slane %v316_v14, 7  ;;  %s309_s10 = scalar_select %p308_p13, %s2010_s19, 1 }
  0x7a   : > { %1571 = vmatpush3.bf16.msra.mxu0 %v1568_v3  ;;  %v324_v11 = vrot.slane %v315_v9, 7  ;;  %v1225_v17 = vld [vmem:[%s2186_s23 + $0x78] sm:$0xff]  ;;  %v327_v22 = vrot.slane %v317_v15, 7  ;;  %v705_v26 = vld [vmem:[%s2213_s7] sm:$0xff]  ;;  %v338_v28 = vld [vmem:[%s2186_s23 + $0x8] sm:$0xff]  ;;  %s1077_s11 = sshll.u32 %s306_s22, 4  ;;  %s2360_s11 = int_to_ptr.vmem [resolvable:$true] %s1077_s11 }
  0x7b   : > { %1573 = vmatprep.subr.bf16.mxu0 %v1572_v5  ;;  %v2200_v13 = vsel %vm322_vm0, 0.0, %v323_v10  ;;  %v1580_v23 = vpack.c.bf16 %v1225_v17, %v1224_v16  ;;  %v337_v27 = vld [vmem:[%s2186_s23] sm:$0xff]  ;;  %v2223_v30 = vsel %vm322_vm0, 0.0, %v326_v21  ;;  %v706_v31 = vld [vmem:[%s2213_s7 + $0x8] sm:$0xff]  ;;  %v707_v32 = vld [vmem:[%s2213_s7 + $0x10] sm:$0xff]  ;;  %s1217_s24 = sshll.u32 %s309_s10, 1 }
  0x7c   : > { %v2205_v18 = vsel %vm322_vm0, %v323_v10, %v324_v11  ;;  %v350_v19 = vrot.slane %v2200_v13, 1  ;;  %v2211_v25 = vsel %vm322_vm0, %v324_v11, 0.0  ;;  %v2220_v29 = vsel %vm322_vm0, %v326_v21, %v327_v22  ;;  %v708_v33 = vld [vmem:[%s2213_s7 + $0x18] sm:$0xff]  ;;  %v339_v37 = vld [vmem:[%s2186_s23 + $0x10] sm:$0xff]  ;;  %v709_v43 = vld [vmem:[%s2213_s7 + $0x20] sm:$0xff]  ;;  %s311_s8 = scalar_lea.vmem %s2412_s3, %s1217_s24  ;;  %s1291_s17 = sshll.u32 %s2010_s19, 9 }
  0x7d   : > { %v351_v20 = vrot.slane %v2205_v18, 1  ;;  %v353_v34 = vrot.slane %v2211_v25, 1  ;;  %v1648_v35 = vpack.c.bf16 %v706_v31, %v705_v26  ;;  %v1584_v36 = vpack.c.bf16 %v338_v28, %v337_v27  ;;  %v340_v41 = vld [vmem:[%s2186_s23 + $0x18] sm:$0xff]  ;;  %v710_v44 = vld [vmem:[%s2213_s7 + $0x28] sm:$0xff]  ;;  %v341_v48 = vld [vmem:[%s2186_s23 + $0x20] sm:$0xff]  ;;  %s2365_s5 = scalar_lea.hbm %s2413_s4, %s1291_s17  ;;  %s1063_s9 = scalar_lea.sflag [#allocation4], %s2174_s20 }
  0x7e   : > { %1575 = vmatpush3.bf16.msra.mxu0 %v1572_v5  ;;  %v355_v38 = vrot.slane %v2223_v30, 1  ;;  %v356_v39 = vrot.slane %v2220_v29, 1  ;;  %v2233_v40 = vsel %vm322_vm0, %v327_v22, 0.0  ;;  %v1652_v42 = vpack.c.bf16 %v708_v33, %v707_v32  ;;  %v342_v51 = vld [vmem:[%s2186_s23 + $0x28] sm:$0xff]  ;;  %v711_v52 = vld [vmem:[%s2213_s7 + $0x30] sm:$0xff]  ;;  %v712_v53 = vld [vmem:[%s2213_s7 + $0x38] sm:$0xff] }
  0x7f   : > { %1577 = vmatprep.subr.bf16.mxu0 %v1576_v12  ;;  %v352_v24 = vsel %vm349_vm1, %v350_v19, %v351_v20  ;;  %1649 = vmatprep.subr.bf16.mxu1 %v1648_v35  ;;  %v354_v45 = vsel %vm349_vm1, %v351_v20, %v353_v34  ;;  %v358_v46 = vrot.slane %v2233_v40, 1  ;;  %v1588_v47 = vpack.c.bf16 %v340_v41, %v339_v37  ;;  %v713_v57 = vld [vmem:[%s2213_s7 + $0x40] sm:$0xff]  ;;  %v714_v58 = vld [vmem:[%s2213_s7 + $0x48] sm:$0xff]  ;;  %v343_v59 = vld [vmem:[%s2186_s23 + $0x30] sm:$0xff]  ;;  %s1884_s19 = scalar_lea.vmem %s2360_s11, 512  ;;  %p2431_p8 = scmp.ne.s32.totalorder %s2421_s26, 0 }
  0x80   : > { %1404 = vmatprep.mubr.msk.f32.mxu0 %vm369_vm2, %v352_v24  ;;  %1651 = vmatpush3.bf16.msra.mxu1 %v1648_v35  ;;  %v357_v49 = vsel %vm349_vm1, %v355_v38, %v356_v39  ;;  %v1656_v50 = vpack.c.bf16 %v710_v44, %v709_v43  ;;  %v1592_v55 = vpack.c.bf16 %v342_v51, %v341_v48  ;;  %v344_v60 = vld [vmem:[%s2186_s23 + $0x38] sm:$0xff]  ;;  %v715_v63 = vld [vmem:[%s2213_s7 + $0x50] sm:$0xff]  ;;  %v1234_v1 = vld [vmem:[%s2186_s23 + $0x80] sm:$0xff]  ;;  %v557_v8 = vrot.slane %v2200_v13, 2  ;;  %p1885_p5 = scmp.ne.s32.totalorder %s2360_s11, %s1884_s19  ;;  %s1961_s29 = smov [#allocation8]  }
  0x81   : > { %1653 = vmatprep.subr.bf16.mxu1 %v1652_v42  ;;  %v359_v54 = vsel %vm349_vm1, %v356_v39, %v358_v46  ;;  %v1660_v56 = vpack.c.bf16 %v712_v53, %v711_v52  ;;  %v1664_v61 = vpack.c.bf16 %v714_v58, %v713_v57  ;;  %v1596_v62 = vpack.c.bf16 %v344_v60, %v343_v59  ;;  %v716_v0 = vld [vmem:[%s2213_s7 + $0x58] sm:$0xff]  ;;  %v1235_v2 = vld [vmem:[%s2186_s23 + $0x88] sm:$0xff]  ;;  %v1236_v5 = vld [vmem:[%s2186_s23 + $0x90] sm:$0xff]  ;;  %s1888_s12 = sshll.u32 %s1961_s29, 4  ;;  %s1889_s12 = int_to_ptr.vmem [resolvable:$false] %s1888_s12 }
  0x82   : > { %1579 = vmatpush3.bf16.msra.mxu0 %v1576_v12  ;;  %v1668_v3 = vpack.c.bf16 %v716_v0, %v715_v63  ;;  %v1600_v4 = vpack.c.bf16 %v1235_v2, %v1234_v1  ;;  %v1237_v6 = vld [vmem:[%s2186_s23 + $0x98] sm:$0xff]  ;;  %v558_v9 = vrot.slane %v2205_v18, 2  ;;  %v1238_v10 = vld [vmem:[%s2186_s23 + $0xa0] sm:$0xff]  ;;  %v1239_v11 = vld [vmem:[%s2186_s23 + $0xa8] sm:$0xff]  ;;  %v560_v19 = vrot.slane %v2211_v25, 2  ;;  %p1886_p10 = pnand %p1885_p5, %p2431_p8  ;;  %s1890_s13 = scalar_lea.vmem %s1889_s12, 1024 }
  0x83   : > { %1581 = vmatprep.subr.bf16.mxu0 %v1580_v23  ;;  %v1604_v7 = vpack.c.bf16 %v1237_v6, %v1236_v5  ;;  %v1608_v12 = vpack.c.bf16 %v1239_v11, %v1238_v10  ;;  %v1241_v15 = vld [vmem:[%s2186_s23 + $0xb8] sm:$0xff]  ;;  %v1246_v17 = vld [vmem:[%s2213_s7 + $0x80] sm:$0xff]  ;;  %v562_v20 = vrot.slane %v2223_v30, 2  ;;  %v563_v21 = vrot.slane %v2220_v29, 2  ;;  %v1252_v33 = vld [vmem:[%s2213_s7 + $0xb0] sm:$0xff]  ;;  %p1891_p9 = scmp.lt.s32.totalorder %s2360_s11, %s1889_s12  ;;  %p1892_p12 = scmp.lt.s32.totalorder %s1890_s13, %s1884_s19 }
  0x84   : > { %1655 = vmatpush3.bf16.msra.mxu1 %v1652_v42  ;;  %v559_v14 = vsel %vm556_vm3, %v557_v8, %v558_v9  ;;  %v1249_v24 = vld [vmem:[%s2213_s7 + $0x98] sm:$0xff]  ;;  %v561_v26 = vsel %vm556_vm3, %v558_v9, %v560_v19  ;;  %v565_v27 = vrot.slane %v2233_v40, 2  ;;  %v1250_v31 = vld [vmem:[%s2213_s7 + $0xa0] sm:$0xff]  ;;  %v1255_v37 = vld [vmem:[%s2213_s7 + $0xc8] sm:$0xff]  ;;  %v673_v57 = vlaneseq  ;;  %p1887_p6 = pneg %p1886_p10 }
  0x85   : > { %1657 = vmatprep.subr.bf16.mxu1 %v1656_v50  ;;  %v564_v28 = vsel %vm556_vm3, %v562_v20, %v563_v21  ;;  %v1253_v34 = vld [vmem:[%s2213_s7 + $0xb8] sm:$0xff]  ;;  %v717_v39 = vld [vmem:[%s2213_s7 + $0x60] sm:$0xff]  ;;  %v718_v40 = vld [vmem:[%s2213_s7 + $0x68] sm:$0xff]  ;;  %p1893_p2 = por %p1892_p12, %p1891_p9 }
  0x86   : > { %1583 = vmatpush3.bf16.msra.mxu0 %v1580_v23  ;;  %v1248_v23 = vld [vmem:[%s2213_s7 + $0x90] sm:$0xff]  ;;  %v1628_v35 = vpack.c.bf16 %v1253_v34, %v1252_v33  ;;  %v1672_v41 = vpack.c.bf16 %v718_v40, %v717_v39  ;;  %v1257_v43 = vld [vmem:[%s2213_s7 + $0xd8] sm:$0xff]  ;;  %v1258_v48 = vld [vmem:[%s2213_s7 + $0xe0] sm:$0xff]  ;;  %v2309_v58 = vshrl.u32 %v673_v57, 7 }
  0x87   : > { %1585 = vmatprep.subr.bf16.mxu0 %v1584_v36  ;;  %v1620_v25 = vpack.c.bf16 %v1249_v24, %v1248_v23  ;;  %v1256_v42 = vld [vmem:[%s2213_s7 + $0xd0] sm:$0xff]  ;;  %v720_v46 = vld [vmem:[%s2213_s7 + $0x78] sm:$0xff]  ;;  %v1266_v51 = vld [vmem:[%s2213_s7 + $0x100] sm:$0xff]  ;;  %p1894_p11 = pnand %p1893_p2, %p1887_p6 }
  0x88   : > { %1659 = vmatpush3.bf16.msra.mxu1 %v1656_v50  ;;  %v1636_v44 = vpack.c.bf16 %v1257_v43, %v1256_v42  ;;  %v1267_v52 = vld [vmem:[%s2213_s7 + $0x108] sm:$0xff]  ;;  %v675_v59 = vsub.s32 0, %v2309_v58  ;;  %v2315_v60 = vld [vmem:[%s311_s8] sm:$0x3]  ;;  %vm2319_vm4 = vmneg %vm322_vm0 }
  0x89   : > { %1405 = vmatmul.mubr.msk.f32.vlgmr.msra.gmra.mrb[0].mxu0 %vm369_vm2, %v354_v45  ;;  %1661 = vmatprep.subr.bf16.mxu1 %v1660_v56  ;;  %v719_v45 = vld [vmem:[%s2213_s7 + $0x70] sm:$0xff]  ;;  %v1680_v53 = vpack.c.bf16 %v1267_v52, %v1266_v51  ;;  %v1269_v10 = vld [vmem:[%s2213_s7 + $0x118] sm:$0xff]  ;;  %v1270_v19 = vld [vmem:[%s2213_s7 + $0x120] sm:$0xff] }
  0x8a   : > { %1587 = vmatpush3.bf16.msra.mxu0 %v1584_v36  ;;  %1407 = vmatprep.mubr.msk.f32.mxu0 %vm369_vm2, %v357_v49  ;;  %v1254_v36 = vld [vmem:[%s2213_s7 + $0xc0] sm:$0xff]  ;;  %v1259_v49 = vld [vmem:[%s2213_s7 + $0xe8] sm:$0xff]  ;;  %v1268_v9 = vld [vmem:[%s2213_s7 + $0x110] sm:$0xff] }
  0x8b   : > { %1589 = vmatprep.subr.bf16.mxu0 %v1588_v47  ;;  %v1632_v38 = vpack.c.bf16 %v1255_v37, %v1254_v36  ;;  %v1640_v50 = vpack.c.bf16 %v1259_v49, %v1258_v48  ;;  %v1271_v20 = vld [vmem:[%s2213_s7 + $0x128] sm:$0xff]  ;;  %v1273_v36 = vld [vmem:[%s2213_s7 + $0x138] sm:$0xff] }
  0x8c   : > { %1663 = vmatpush3.bf16.msra.mxu1 %v1660_v56  ;;  %v1275_v51 = vld [vmem:[%s2213_s7 + $0x148] sm:$0xff] }
  0x8d   : > { %1408 = vmatmul.mubr.msk.f32.gmra.mrb[2].mxu0 %vm369_vm2, %v359_v54  ;;  %1665 = vmatprep.subr.bf16.mxu1 %v1664_v61  ;;  %v1260_v54 = vld [vmem:[%s2213_s7 + $0xf0] sm:$0xff]  ;;  %v1279_v57 = vld [vmem:[%s2213_s7 + $0x168] sm:$0xff] }
  0x8e   : > { %1591 = vmatpush3.bf16.msra.mxu0 %v1588_v47  ;;  %1426 = vmatprep.mubr.msk.f32.mxu0 %vm369_vm2, %v2200_v13  ;;  %v1240_v13 = vld [vmem:[%s2186_s23 + $0xb0] sm:$0xff]  ;;  %v1676_v47 = vpack.c.bf16 %v720_v46, %v719_v45 }
  0x8f   : > { %1593 = vmatprep.subr.bf16.mxu0 %v1592_v55  ;;  %v1612_v16 = vpack.c.bf16 %v1241_v15, %v1240_v13 }
  0x90   : > { %1667 = vmatpush3.bf16.msra.mxu1 %v1664_v61  ;;  %v676_v61 = vrot.slane %v2315_v60, %v675_v59 }
  0x91   : > { %1669 = vmatprep.subr.bf16.mxu1 %v1668_v3 }
  0x92   : > { %1595 = vmatpush3.bf16.msra.mxu0 %v1592_v55  ;;  %v1261_v55 = vld [vmem:[%s2213_s7 + $0xf8] sm:$0xff] }
  0x93   : > { %1597 = vmatprep.subr.bf16.mxu0 %v1596_v62  ;;  %v1644_v56 = vpack.c.bf16 %v1261_v55, %v1260_v54  ;;  %v1277_v54 = vld [vmem:[%s2213_s7 + $0x158] sm:$0xff] }
  0x94   : > { %1671 = vmatpush3.bf16.msra.mxu1 %v1668_v3 }
  0x95   : > { %1673 = vmatprep.subr.bf16.mxu1 %v1672_v41 }
  0x96   : > { %1599 = vmatpush3.bf16.msra.mxu0 %v1596_v62 }
  0x97   : > { %1601 = vmatprep.subr.bf16.mxu0 %v1600_v4 }
  0x98   : > { %1675 = vmatpush3.bf16.msra.mxu1 %v1672_v41 }
  0x99   : > { %1427 = vmatmul.mubr.msk.f32.vlgmr.msra.gmra.mrb[0].mxu0 %vm369_vm2, %v2205_v18  ;;  %v1247_v18 = vld [vmem:[%s2213_s7 + $0x88] sm:$0xff]  ;;  %1677 = vmatprep.subr.bf16.mxu1 %v1676_v47 }
  0x9a   : > { %1603 = vmatpush3.bf16.msra.mxu0 %v1600_v4  ;;  %1429 = vmatprep.mubr.msk.f32.mxu0 %vm369_vm2, %v2223_v30  ;;  %v1616_v22 = vpack.c.bf16 %v1247_v18, %v1246_v17  ;;  %v1251_v30 = vld [vmem:[%s2213_s7 + $0xa8] sm:$0xff]  ;;  %v1684_v18 = vpack.c.bf16 %v1269_v10, %v1268_v9 }
  0x9b   : > { %1605 = vmatprep.subr.bf16.mxu0 %v1604_v7  ;;  %v1624_v32 = vpack.c.bf16 %v1251_v30, %v1250_v31  ;;  %v1688_v30 = vpack.c.bf16 %v1271_v20, %v1270_v19 }
  0x9c   : > { %1679 = vmatpush3.bf16.msra.mxu1 %v1676_v47 }
  0x9d   : > { %1430 = vmatmul.mubr.msk.f32.gmra.mrb[2].mxu0 %vm369_vm2, %v2220_v29  ;;  %v566_v29 = vsel %vm556_vm3, %v563_v21, %v565_v27  ;;  %1681 = vmatprep.subr.bf16.mxu1 %v1680_v53 }
  0x9e   : > { %1607 = vmatpush3.bf16.msra.mxu0 %v1604_v7  ;;  %1448 = vmatprep.mubr.msk.f32.mxu0 %vm369_vm2, %v559_v14 }
  0x9f   : > { %1609 = vmatprep.subr.bf16.mxu0 %v1608_v12 }
  0xa2   : > { %1611 = vmatpush3.bf16.msra.mxu0 %v1608_v12 }
  0xa3   : > { %1613 = vmatprep.subr.bf16.mxu0 %v1612_v16 }
  0xa6   : > { %1615 = vmatpush3.bf16.msra.mxu0 %v1612_v16 }
  0xa7   : > { %1617 = vmatprep.subr.bf16.mxu0 %v1616_v22 }
  0xa9   : > { %1449 = vmatmul.mubr.msk.f32.vlgmr.msra.gmra.mrb[0].mxu0 %vm369_vm2, %v561_v26 }
  0xaa   : > { %1451 = vmatprep.mubr.msk.f32.mxu0 %vm369_vm2, %v564_v28  ;;  %1619 = vmatpush3.bf16.msra.mxu0 %v1616_v22 }
  0xab   : > { %1621 = vmatprep.subr.bf16.mxu0 %v1620_v25 }
  0xad   : > { %1452 = vmatmul.mubr.msk.f32.gmra.mrb[2].mxu0 %vm369_vm2, %v566_v29 }
  0xae   : > { %1623 = vmatpush3.bf16.msra.mxu0 %v1620_v25 }
  0xaf   : > { %1625 = vmatprep.subr.bf16.mxu0 %v1624_v32 }
  0xb2   : > { %1627 = vmatpush3.bf16.msra.mxu0 %v1624_v32 }
  0xb3   : > { %1629 = vmatprep.subr.bf16.mxu0 %v1628_v35 }
  0xb6   : > { %1631 = vmatpush3.bf16.msra.mxu0 %v1628_v35  ;;  %v1272_v35 = vld [vmem:[%s2213_s7 + $0x130] sm:$0xff] }
  0xb7   : > { %1633 = vmatprep.subr.bf16.mxu0 %v1632_v38  ;;  %v1692_v45 = vpack.c.bf16 %v1273_v36, %v1272_v35 }
  0xba   : > { %1635 = vmatpush3.bf16.msra.mxu0 %v1632_v38 }
  0xbb   : > { %1637 = vmatprep.subr.bf16.mxu0 %v1636_v44 }
  0xbe   : > { %1639 = vmatpush3.bf16.msra.mxu0 %v1636_v44 }
  0xbf   : > { %1641 = vmatprep.subr.bf16.mxu0 %v1640_v50 }
  0xc2   : > { %1643 = vmatpush3.bf16.msra.mxu0 %v1640_v50  ;;  %v1274_v50 = vld [vmem:[%s2213_s7 + $0x140] sm:$0xff] }
  0xc3   : > { %1645 = vmatprep.subr.bf16.mxu0 %v1644_v56  ;;  %v1696_v52 = vpack.c.bf16 %v1275_v51, %v1274_v50 }
  0xc6   : > { %1647 = vmatpush3.bf16.msra.mxu0 %v1644_v56  ;;  %v1278_v56 = vld [vmem:[%s2213_s7 + $0x160] sm:$0xff] }
  0xc7   : > { %v1704_v59 = vpack.c.bf16 %v1279_v57, %v1278_v56 }
 0x17c   : > { %v1450_v62 = vpop.f32.mrb[0].mxu0 }
 0x17d   : > { %v678_v63 = vadd.f32 %v1450_v62, %v676_v61  ;;  %v650_v0 = vpop.f32.mrb[1].mxu0  ;;  %v1281_v62 = vld [vmem:[%s2213_s7 + $0x178] sm:$0xff] }
 0x17e   : > { %v677_v1 = vadd.f32 %v676_v61, %v650_v0 }
 0x17f   : > { %v682_v2 = vmax.f32 %v678_v63, 0.0 }
 0x180   : > { %v681_v3 = vmax.f32 %v677_v1, 0.0  ;;  %v1453_v4 = vpop.f32.mrb[2].mxu0 }
 0x181   : > { %v690_v5 = vrot.slane %v682_v2, 7  ;;  %v680_v6 = vadd.f32 %v1453_v4, %v676_v61  ;;  %v660_v7 = vpop.f32.mrb[3].mxu0  ;;  %v1048_v4 = vsub.s32 1, %v2309_v58 }
 0x182   : > { %v689_v11 = vrot.slane %v681_v3, 7  ;;  %v679_v12 = vadd.f32 %v676_v61, %v660_v7  ;;  %v1280_v61 = vld [vmem:[%s2213_s7 + $0x170] sm:$0xff] }
 0x183   : > { %v703_v14 = vsel %vm322_vm0, %v690_v5, 0.0  ;;  %v684_v13 = vmax.f32 %v680_v6, 0.0  ;;  %v1708_v63 = vpack.c.bf16 %v1281_v62, %v1280_v61 }
 0x184   : > { %v728_v15 = vrot.slane %v703_v14, 1  ;;  %v701_v16 = vsel %vm322_vm0, 0.0, %v689_v11  ;;  %v683_v17 = vmax.f32 %v679_v12, 0.0  ;;  %1524 = vmatprep.mubr.msk.f32.mxu1 %vm2319_vm4, %v689_v11  ;;  %v691_v22 = vsel %vm322_vm0, %v689_v11, %v690_v5 }
 0x185   : > { %v693_v21 = vrot.slane %v684_v13, 7  ;;  %v725_v23 = vrot.slane %v701_v16, 1  ;;  %v926_v24 = vrot.slane %v701_v16, 2  ;;  %v929_v26 = vrot.slane %v703_v14, 2  ;;  %1525 = vmatmul.mubr.f32.vlgmr.msra.gmra.mrb[0].mxu1 %v691_v22 }
 0x186   : > { %v692_v27 = vrot.slane %v683_v17, 7  ;;  %v726_v28 = vrot.slane %v691_v22, 1  ;;  %v927_v25 = vrot.slane %v691_v22, 2  ;;  %1683 = vmatpush3.bf16.msra.mxu1 %v1680_v53  ;;  %v1276_v53 = vld [vmem:[%s2213_s7 + $0x150] sm:$0xff]  ;;  %v1049_v5 = vrot.slane %v2315_v60, %v1048_v4 }
 0x187   : > { %v704_v31 = vsel %vm322_vm0, %v693_v21, 0.0  ;;  %1685 = vmatprep.subr.bf16.mxu1 %v1684_v18  ;;  %v1700_v55 = vpack.c.bf16 %v1277_v54, %v1276_v53 }
 0x188   : > { %v733_v29 = vrot.slane %v704_v31, 1  ;;  %v934_v32 = vrot.slane %v704_v31, 2  ;;  %v702_v33 = vsel %vm322_vm0, 0.0, %v692_v27  ;;  %v727_v34 = vsel %vm349_vm1, %v725_v23, %v726_v28  ;;  %1527 = vmatprep.mubr.msk.f32.mxu1 %vm2319_vm4, %v692_v27 }
 0x189   : > { %1486 = vmatprep.mubr.f32.mxu0 %v727_v34  ;;  %v729_v37 = vsel %vm349_vm1, %v726_v28, %v728_v15  ;;  %v694_v38 = vsel %vm322_vm0, %v692_v27, %v693_v21  ;;  %v928_v39 = vsel %vm556_vm3, %v926_v24, %v927_v25  ;;  %v730_v40 = vrot.slane %v702_v33, 1 }
 0x18a   : > { %1487 = vmatmul.mubr.f32.vlgmr.msra.gmra.mrb[4].mxu0 %v729_v37  ;;  %v731_v41 = vrot.slane %v694_v38, 1  ;;  %1528 = vmatmul.mubr.f32.gmra.mrb[2].mxu1 %v694_v38  ;;  %v932_v42 = vrot.slane %v694_v38, 2  ;;  %v930_v43 = vsel %vm556_vm3, %v927_v25, %v929_v26  ;;  %v931_v44 = vrot.slane %v702_v33, 2 }
 0x18b   : > { %1687 = vmatpush3.bf16.msra.mxu1 %v1684_v18  ;;  %1562 = vmatprep.mubr.f32.mxu1 %v928_v39 }
 0x18c   : > { %v732_v46 = vsel %vm349_vm1, %v730_v40, %v731_v41  ;;  %1689 = vmatprep.subr.bf16.mxu1 %v1688_v30  ;;  %v734_v47 = vsel %vm349_vm1, %v731_v41, %v733_v29  ;;  %v933_v48 = vsel %vm556_vm3, %v931_v44, %v932_v42  ;;  %v935_v49 = vsel %vm556_vm3, %v932_v42, %v934_v32 }
 0x18d   : > { %1489 = vmatprep.mubr.f32.mxu0 %v732_v46 }
 0x18e   : > { %1490 = vmatmul.mubr.f32.gmra.mrb[6].mxu0 %v734_v47 }
 0x18f   : > { %1691 = vmatpush3.bf16.msra.mxu1 %v1688_v30 }
 0x190   : > { %1693 = vmatprep.subr.bf16.mxu1 %v1692_v45 }
 0x193   : > { %1695 = vmatpush3.bf16.msra.mxu1 %v1692_v45 }
 0x194   : > { %1697 = vmatprep.subr.bf16.mxu1 %v1696_v52 }
 0x197   : > { %1699 = vmatpush3.bf16.msra.mxu1 %v1696_v52 }
 0x198   : > { %1701 = vmatprep.subr.bf16.mxu1 %v1700_v55 }
 0x19b   : > { %1703 = vmatpush3.bf16.msra.mxu1 %v1700_v55 }
 0x19c   : > { %1705 = vmatprep.subr.bf16.mxu1 %v1704_v59 }
 0x19f   : > { %1707 = vmatpush3.bf16.msra.mxu1 %v1704_v59 }
 0x1a0   : > { %1709 = vmatprep.subr.bf16.mxu1 %v1708_v63 }
 0x1a3   : > { %1711 = vmatpush3.bf16.msra.mxu1 %v1708_v63 }
 0x1a6   : > { %1563 = vmatmul.mubr.f32.vlgmr.msra.gmra.mrb[0].mxu1 %v930_v43 }
 0x1a7   : > { %1565 = vmatprep.mubr.f32.mxu1 %v933_v48 }
 0x1aa   : > { %1566 = vmatmul.mubr.f32.gmra.mrb[2].mxu1 %v935_v49 }
 0x25d   : > { %v1488_v0 = vpop.f32.mrb[4].mxu0 }
 0x25e   : > { %v822_v1 = vpop.f32.mrb[5].mxu0 }
 0x261   : > { %v1491_v2 = vpop.f32.mrb[6].mxu0 }
 0x262   : > { %v832_v3 = vpop.f32.mrb[7].mxu0 }
 0x279   : > { %v1564_v6 = vpop.f32.mrb[0].mxu1 }
 0x27a   : > { %v1712_v7 = vadd.f32 %v1564_v6, %v1488_v0  ;;  %v1023_v8 = vpop.f32.mrb[1].mxu1 }
 0x27b   : > { %v1713_v9 = vadd.f32 %v1023_v8, %v822_v1 }
 0x27c   : > { %v1051_v10 = vadd.f32 %v1712_v7, %v1049_v5 }
 0x27d   : > { %v1050_v11 = vadd.f32 %v1713_v9, %v1049_v5  ;;  %v1567_v12 = vpop.f32.mrb[2].mxu1 }
 0x27e   : > { %v1055_v14 = vmax.f32 %v1051_v10, 0.0  ;;  %v1714_v13 = vadd.f32 %v1567_v12, %v1491_v2  ;;  %v1033_v15 = vpop.f32.mrb[3].mxu1 }
 0x27f   : > { %v1054_v16 = vmax.f32 %v1050_v11, 0.0  ;;  %v1715_v58 = vadd.f32 %v1033_v15, %v832_v3 }
 0x280   : > { %1059 = vst [vmem:[%s306_s22 + $0x8] sm:$0xff] %v1055_v14  ;;  %v1053_v60 = vadd.f32 %v1714_v13, %v1049_v5 }
 0x281   : > { %1058 = vst [vmem:[%s306_s22] sm:$0xff] %v1054_v16  ;;  %v1052_v17 = vadd.f32 %v1715_v58, %v1049_v5 }
 0x282   : > { %v1057_v18 = vmax.f32 %v1053_v60, 0.0 }
 0x283   : > { %v1056_v19 = vmax.f32 %v1052_v17, 0.0 }
 0x284   : > { %1061 = vst [vmem:[%s306_s22 + $0x18] sm:$0xff] %v1057_v18 }
 0x285   : > { %1060 = vst [vmem:[%s306_s22 + $0x10] sm:$0xff] %v1056_v19 }
 0x286   : > { %1897 = shalt.err (!%p1894_p11)
}
 0x287   : > { %s1898_s14 = scalar_lea.hbm %s2365_s5, 512  ;;  %s1902_s7 = scalar_lea.hbm %s2413_s4, 1024 }
 0x288   : > { %p1899_p7 = scmp.ne.s32.totalorder %s2365_s5, %s1898_s14  ;;  %p1903_p4 = scmp.lt.u32.totalorder %s2365_s5, %s2413_s4 }
 0x289   : > { %p1904_p1 = scmp.lt.u32.totalorder %s1902_s7, %s1898_s14  ;;  %p1906_p5 = scmp.lt.u32.totalorder %s1898_s14, %s2365_s5 }
 0x28a   : > { %p1900_p0 = pnand %p1899_p7, %p2431_p8 }
 0x28b   : > { %p1905_p13 = por %p1904_p1, %p1903_p4 }
 0x28c   : > { %p1901_p3 = pneg %p1900_p0 }
 0x28d   : > { %p1907_p10 = por %p1906_p5, %p1905_p13 }
 0x28f   : > { %p1908_p6 = pnand %p1907_p10, %p1901_p3 }
 0x291   : > { %1911 = shalt.err (!%p1908_p6)
}
 0x292   : > { %s1962_s28 = smov 128   ;;  %s1963_s1 = smov 8  }
 0x293   : > { %1740 = dma.vmem_to_hbm [thread:$0]  (%p2431_p8), %s2360_s11, 512, %s2365_s5, %s1063_s9, %s1962_s28, %s1962_s28, %s1963_s1  }
 0x294 PF: > { %s1092_s8 = sand.u32 1, %s1942_s15   ;;  %p2432_p9 = scmp.ne.s32.totalorder %s2422_s27, 0 }
 0x295   : > { %p2433_p12 = scmp.ge.s32.totalorder %s1954_s18, 2  ;;  %s1093_s22 = scalar_lea.sflag [#allocation4], %s1092_s8 }
 0x297   : > { %p1753_p2 = pnand %p2433_p12, %p2432_p9 }
 0x299   : > { %1937 = dma.done.wait (!%p1753_p2), %s1093_s22, 512  }
 0x29a   : > { %1939 = vsyncadd (!%p1753_p2), %s1093_s22, 4294966784  ;;  %s2434_s17 = sld [smem:[#allocation12_spill]]  ;;  %s2435_s6 = sld [smem:[#allocation13_spill]] }
 0x29b   : > { %p20_p11 = scmp.ge.s32.totalorder %s2014_s21, 4   ;;  %s2436_s15 = smov %s1946_s16 }
 0x29c   : > { %s2439_s18 = smov %s2014_s21 }
 0x29d   :  { %22 = sbr.rel (!%p20_p11) target bundleno = 9 (0x9), region = 112 }
 0x2a0   : > { %s2437_s16 = smov %s2434_s17  ;;  %s2438_s17 = smov %s2435_s6 }
 0x2a4   :  { %1098 = vsyncpa [#allocation3], 1 }
 0x2a5   :  { %1100 = vsyncpa [#allocation3 + $0x1], 1 }
 0x2a6   :  { %1101 = vsyncpa [#allocation6], 1 }
 0x2a7   :  { %1103 = vsyncpa [#allocation6 + $0x1], 1 }
 0x2a8   :  { %1104 = vsyncpa [#allocation4], 1 }
 0x2a9   :  { %1106 = vsyncpa [#allocation4 + $0x1], 1 }

</bundles_post_ra>
